<compile_context>
chip_gen: v7x
topology: tpu7x:2x2x1
jax: 0.10.0
libtpu: 0.0.40
codegen_flags: <defaults>
</compile_context>

<pallas_src>
import jax
import jax.numpy as jnp
from jax.experimental import pallas as pl
from jax.experimental.pallas import tpu as pltpu


def _hbm_copy_kernel(x_hbm, o_hbm, sem):
    # Canonical memcpy: one DMA descriptor covering the whole array,
    # HBM -> HBM, no VMEM round-trip and no TensorCore vector work.
    cp = pltpu.make_async_copy(x_hbm, o_hbm, sem)
    cp.start()
    cp.wait()


def _lane_dense_2d_shape(x: jax.Array) -> tuple:
    """Pick a lane-dense 2D view of `x` for the copy.

    Prefer a last dim that is a large multiple of 128 (512-2048) so any
    staging / layout handling is unmasked and lane-full; fall back to
    (rows, d) when the total size is not 128-divisible.
    """
    size = int(x.size)
    d = int(x.shape[-1]) if x.ndim >= 1 else 1
    if size % 128 == 0:
        for lanes in (2048, 1024, 512, 256, 128):
            if size % lanes == 0:
                return (size // lanes, lanes)
    return (size // d, d)


def _persistent_memory_copy_kernel(x: jax.Array) -> jax.Array:
    """Explicit, independent on-device copy of `x` via a direct HBM->HBM DMA."""
    if x.size == 0:
        return x

    orig_shape = x.shape
    rows, cols = _lane_dense_2d_shape(x)
    x2 = x.reshape(rows, cols)
    itemsize = jnp.dtype(x.dtype).itemsize

    y2 = pl.pallas_call(
        _hbm_copy_kernel,
        out_shape=jax.ShapeDtypeStruct((rows, cols), x.dtype),
        # Leave both operands in place (HBM); the kernel DMAs directly.
        in_specs=[pl.BlockSpec(memory_space=pl.ANY)],
        out_specs=pl.BlockSpec(memory_space=pl.ANY),
        scratch_shapes=[pltpu.SemaphoreType.DMA(())],
        cost_estimate=pl.CostEstimate(
            flops=0,
            transcendentals=0,
            bytes_accessed=2 * x.size * itemsize,
        ),
    )(x2)

    return y2.reshape(orig_shape)


def persistent_memory_forward(x: jax.Array, *, force_kernel: bool = False) -> jax.Array:
    """PersistentMemory.forward: identity.

    Default path is zero-cost (no kernel launch, no HBM traffic) -- exactly
    the PyTorch module's semantics.  Set `force_kernel=True` to produce an
    explicit independent copy via the HBM->HBM DMA Pallas kernel.
    """
    if not force_kernel:
        return x
    return _persistent_memory_copy_kernel(x)


if __name__ == "__main__":
    # Small shapes consistent with the module's forward (token activations):
    # batch=2, seq=8, dim=32.
    key = jax.random.PRNGKey(0)
    x = jax.random.normal(key, (2, 8, 32), dtype=jnp.float32)

    # Zero-cost identity path (the recommended production path).
    y_fast = persistent_memory_forward(x)

    # Explicit Pallas HBM->HBM DMA copy path (exercised once for validation).
    y_kernel = persistent_memory_forward(x, force_kernel=True)
    jax.block_until_ready(y_kernel)

    assert y_fast.shape == x.shape and y_fast.dtype == x.dtype
    assert y_kernel.shape == x.shape and y_kernel.dtype == x.dtype
    assert bool(jnp.all(y_fast == x))
    assert bool(jnp.all(y_kernel == x))

    print("KERNEL_OK")
</pallas_src>

<mosaic_0001>
module attributes {stable_mosaic.version = 11 : i64} {
  func.func @_hbm_copy_kernel(%arg0: memref<1x512xf32, #tpu.memory_space<any>>, %arg1: memref<1x512xf32, #tpu.memory_space<any>>, %arg2: memref<!tpu.dma_semaphore, #tpu.memory_space<semaphore_mem>>) attributes {dimension_semantics = [], scalar_prefetch = 0 : i64, scratch_operands = 1 : i64, tpu.core_type = #tpu.core_type<tc>} {
    tpu.enqueue_dma source(%arg0 : memref<1x512xf32, #tpu.memory_space<any>>) target(%arg1 : memref<1x512xf32, #tpu.memory_space<any>>) target_semaphore(%arg2 : memref<!tpu.dma_semaphore, #tpu.memory_space<semaphore_mem>>)
    tpu.wait_dma2 semaphore(%arg2 : memref<!tpu.dma_semaphore, #tpu.memory_space<semaphore_mem>>) src(%arg0 : memref<1x512xf32, #tpu.memory_space<any>>) dst(%arg1 : memref<1x512xf32, #tpu.memory_space<any>>)
    return
  }
}

</mosaic_0001>

<bundles_post_ra>
// kernel: tpu_custom_call.1
= control target key start
LH: loop header
LB: loop body
LE: loop exit
PB: predicated region body
PF: predicated region fallthrough
CT: control target
= control target key end

     0   :  { %s34_s6 = smov [#allocation2]   ;;  %s35_s7 = smov [#allocation3]   ;;  %s53_s0 = inlined_call_operand.hbm [shape: f32[1,512], index: 0, kind: input, shape index: {}]   ;;  %s54_s1 = inlined_call_operand.hbm [shape: f32[1,512], index: 1, kind: output, shape index: {}]  }
   0x1   :  { %s36_s8 = smov 0  }
   0x2   :  { %18 = dma.general %s53_s0, 64, %s54_s1, %s34_s6, %s35_s7, [#allocation4], %s36_s8, 0  }
   0x3   :  { %32 = dma.done.wait [#allocation2], 64 }
   0x4   :  { %33 = vsyncadd [#allocation2], 4294967232 }
   0x5   :  { %22 = vsyncmov [#allocation2] }
   0x8   :  { %s23_s13 = vpop.sfrf %22 }
   0x9   :  { %p28_p0 = scmp.ne.s32.totalorder %s23_s13, 0 }
   0xb   :  { %27 = shalt.err (%p28_p0)  }

</bundles_post_ra>
